<compile_context>
chip_gen: v6e
topology: v6e:2x2x1
jax: 0.10.0
libtpu: 0.0.40
codegen_flags: <defaults>
</compile_context>

<pallas_src>
import math
import functools

import jax
import jax.numpy as jnp
from jax.experimental import pallas as pl
from jax.experimental.pallas import tpu as pltpu

_LANES = 128
_MAX_STATIC_CHUNKS = 8


def _curricular_kernel(ctm_ref, sft_ref, srew_ref, cos_ref, scal_ref,  # inputs
                       loss_ref,                                       # output
                       *, s, n_chunks):
    j = pl.program_id(1)                      # class-tile index (innermost)

    # ---- init the per-row accumulator (output block, resident over j) -----
    @pl.when(j == 0)
    def _():
        loss_ref[...] = jnp.zeros_like(loss_ref)

    t_val = scal_ref[0]                       # t (scalar)
    bound = scal_ref[1]                       # M = s * (t + 1)  (fixed LSE bound)
    ctm = ctm_ref[...]                        # (bm, 1) cos(theta + m) per row

    # ---- fused per-chunk chain: clip -> reweight -> *s -> -M -> exp -> acc --
    def chunk_term(ct_raw):
        ct = jnp.clip(ct_raw.astype(jnp.float32), -1.0, 1.0)
        ct = jnp.where(ct > ctm, ct * (t_val + ct), ct)     # hard-example reweight
        return jnp.exp(ct * s - bound)

    acc = loss_ref[...]                                     # (bm, 128) running sum
    if n_chunks <= _MAX_STATIC_CHUNKS:
        for c in range(n_chunks):
            acc = acc + chunk_term(cos_ref[:, c * _LANES:(c + 1) * _LANES])
    else:
        def body(c, a):
            start = pl.multiple_of(c * _LANES, _LANES)
            return a + chunk_term(cos_ref[:, pl.ds(start, _LANES)])
        acc = jax.lax.fori_loop(0, n_chunks, body, acc, unroll=4)
    loss_ref[...] = acc

    # ---- finalize once per batch tile, on the last class tile --------------
    @pl.when(j == pl.num_programs(1) - 1)
    def _():
        row_sum = jnp.sum(acc, axis=1, keepdims=True)        # (bm, 1), XLU once
        sft = sft_ref[...]                                   # s * final_target
        srew = srew_ref[...]                                 # s * reweighted target
        # remove the un-scattered label column, add the scattered one
        corr = jnp.exp(sft - bound) - jnp.exp(srew - bound)
        lse = bound + jnp.log(row_sum + corr)
        row_loss = lse - sft                                 # (bm, 1)
        loss_ref[...] = jnp.broadcast_to(row_loss, loss_ref.shape)   # lane-dense


def _largest_aligned_divisor(dim, align, cap):
    """Largest multiple of `align` that divides `dim` and is <= cap, else `dim`."""
    start = min(dim, cap)
    start -= start % align
    for cand in range(start, 0, -align):
        if dim % cand == 0:
            return cand
    return dim


def curricular_loss(cos_theta, labels, t, *, s=64.0, m=0.5,
                    block_b=None, block_c=None):
    """Pallas implementation of Curricular.forward(cos_theta, labels)."""
    cos_m = math.cos(m)
    sin_m = math.sin(m)
    threshold = math.cos(math.pi - m)
    mm = math.sin(math.pi - m) * m

    B, C = cos_theta.shape
    # TODO(synk): ragged class counts (C % 128 != 0) would need a masked tail
    # tile; not implemented here.
    assert C % _LANES == 0, "number of classes must be a multiple of 128"

    # Tile sizes: bm capped at 128 and at B//2 (>= 2 batch tiles keeps both
    # v7x TensorCores busy); bc up to 8192 (large class tiles amortize the
    # ~0.35us grid-step overhead; the fused chain keeps VMEM small).
    if block_b is not None:
        bm = block_b
    else:
        bm = _largest_aligned_divisor(B, 8, max(8, min(128, B // 2)))
    bc = block_c if block_c is not None else _largest_aligned_divisor(C, _LANES, 8192)
    assert B % bm == 0 and C % bc == 0 and bc % _LANES == 0
    n_chunks = bc // _LANES
    grid = (B // bm, C // bc)

    # ---- tiny per-row precompute in the wrapper (B elements) ---------------
    labels2 = labels.reshape(B, 1).astype(jnp.int32)
    t_val = t.reshape(()).astype(jnp.float32)
    tl = jnp.clip(jnp.take_along_axis(cos_theta, labels2, axis=1)
                  .astype(jnp.float32), -1.0, 1.0)                    # (B, 1)
    sin_theta = jnp.sqrt(jnp.maximum(1.0 - tl * tl, 0.0))
    ctm = tl * cos_m - sin_theta * sin_m                               # cos(theta+m)
    final_target = jnp.where(tl > threshold, ctm, tl - mm)
    rew_tl = jnp.where(tl > ctm, tl * (t_val + tl), tl)                # un-scattered col
    sft = (s * final_target).astype(jnp.float32)
    srew = (s * rew_tl).astype(jnp.float32)
    bound = s * (t_val + 1.0)                                          # fixed LSE bound
    scalars = jnp.stack([t_val, bound]).astype(jnp.float32)            # (2,) SMEM

    kernel = functools.partial(_curricular_kernel, s=float(s), n_chunks=n_chunks)

    cos_block_bytes = bm * bc * cos_theta.dtype.itemsize
    # double-buffered cos block + small per-row blocks + headroom; cap 48 MiB (v7x)
    vmem_limit_bytes = int(min(48 << 20, max(16 << 20, 2 * cos_block_bytes + (4 << 20))))

    per_row = pl.pallas_call(
        kernel,
        out_shape=jax.ShapeDtypeStruct((B, _LANES), jnp.float32),
        grid=grid,
        in_specs=[
            pl.BlockSpec((bm, 1), lambda i, j: (i, 0)),          # cos_theta_m
            pl.BlockSpec((bm, 1), lambda i, j: (i, 0)),          # s * final_target
            pl.BlockSpec((bm, 1), lambda i, j: (i, 0)),          # s * rew_tl
            pl.BlockSpec((bm, bc), lambda i, j: (i, j)),         # cos_theta tile
            pl.BlockSpec(memory_space=pltpu.MemorySpace.SMEM),   # [t, M] scalars
        ],
        out_specs=pl.BlockSpec((bm, _LANES), lambda i, j: (i, 0)),
        compiler_params=pltpu.CompilerParams(
            dimension_semantics=("parallel", "arbitrary"),
            vmem_limit_bytes=vmem_limit_bytes,
        ),
    )(ctm, sft, srew, cos_theta, scalars)

    return jnp.mean(per_row[:, 0])


def _reference_loss(cos_theta, labels, t, *, s, m):
    """Pure-JAX reference matching the PyTorch module."""
    cos_m, sin_m = math.cos(m), math.sin(m)
    threshold = math.cos(math.pi - m)
    mm = math.sin(math.pi - m) * m
    ct = jnp.clip(cos_theta.astype(jnp.float32), -1.0, 1.0)
    tl = jnp.take_along_axis(ct, labels[:, None], axis=1)
    sin_theta = jnp.sqrt(jnp.maximum(1.0 - tl * tl, 0.0))
    ctm = tl * cos_m - sin_theta * sin_m
    final_target = jnp.where(tl > threshold, ctm, tl - mm)
    ct = jnp.where(ct > ctm, ct * (t[0] + ct), ct)
    onehot = jax.nn.one_hot(labels, ct.shape[1], dtype=bool)
    ct = jnp.where(onehot, final_target, ct)
    logits = ct * s
    lse = jax.scipy.special.logsumexp(logits, axis=1)
    return jnp.mean(lse - s * final_target[:, 0])


if __name__ == "__main__":
    key = jax.random.PRNGKey(0)
    k1, k2, k3, k4 = jax.random.split(key, 4)
    t_buffer = jnp.ones((1,), dtype=jnp.float32)   # register_buffer('t', torch.ones(1))

    # NOTE: the module's default s=None would fail in PyTorch; a concrete
    # scale (64.0) must be supplied, matching standard CurricularFace usage.

    # Case 1: explicit small tiles (static-unrolled chunk path), 2x4 grid.
    B, C = 16, 1024
    cos_theta = jnp.tanh(jax.random.normal(k1, (B, C), dtype=jnp.float32))
    labels = jax.random.randint(k2, (B,), 0, C, dtype=jnp.int32)
    loss = jax.block_until_ready(
        curricular_loss(cos_theta, labels, t_buffer, s=64.0, m=0.5,
                        block_b=8, block_c=256))
    ref = jax.block_until_ready(
        _reference_loss(cos_theta, labels, t_buffer, s=64.0, m=0.5))
    assert jnp.allclose(loss, ref, rtol=5e-3, atol=5e-2), (float(loss), float(ref))

    # Case 2: default tiling (fori_loop chunk path, 16 chunks per class tile).
    B2, C2 = 16, 2048
    cos_theta2 = jnp.tanh(jax.random.normal(k3, (B2, C2), dtype=jnp.float32))
    labels2 = jax.random.randint(k4, (B2,), 0, C2, dtype=jnp.int32)
    loss2 = jax.block_until_ready(
        curricular_loss(cos_theta2, labels2, t_buffer, s=64.0, m=0.5))
    ref2 = jax.block_until_ready(
        _reference_loss(cos_theta2, labels2, t_buffer, s=64.0, m=0.5))
    assert jnp.allclose(loss2, ref2, rtol=5e-3, atol=5e-2), (float(loss2), float(ref2))

    print("KERNEL_OK")
</pallas_src>

<mosaic_0001>
module attributes {stable_mosaic.version = 11 : i64} {
  func.func @_curricular_kernel(%arg0: i32, %arg1: i32, %arg2: memref<8x1xf32, #tpu.memory_space<vmem>>, %arg3: memref<8x1xf32, #tpu.memory_space<vmem>>, %arg4: memref<8x1xf32, #tpu.memory_space<vmem>>, %arg5: memref<8x256xf32, #tpu.memory_space<vmem>>, %arg6: memref<2xf32, #tpu.memory_space<smem>>, %arg7: memref<8x128xf32, #tpu.memory_space<vmem>>) attributes {dimension_semantics = [#tpu.dimension_semantics<parallel>, #tpu.dimension_semantics<arbitrary>], iteration_bounds = array<i64: 2, 4>, scalar_prefetch = 0 : i64, scratch_operands = 0 : i64, tpu.core_type = #tpu.core_type<tc>, window_params = [{transform_indices = @transform_0, window_bounds = array<i64: 8, 1>}, {transform_indices = @transform_1, window_bounds = array<i64: 8, 1>}, {transform_indices = @transform_2, window_bounds = array<i64: 8, 1>}, {transform_indices = @transform_3, window_bounds = array<i64: 8, 256>}, {transform_indices = @transform_4, window_bounds = array<i64: 2>}, {transform_indices = @transform_5, window_bounds = array<i64: 8, 128>}]} {
    %c0_i32 = arith.constant 0 : i32
    %0 = arith.cmpi eq, %arg1, %c0_i32 : i32
    %1 = arith.extui %0 : i1 to i32
    %c0_i32_0 = arith.constant 0 : i32
    %2 = arith.cmpi ne, %1, %c0_i32_0 : i32
    scf.if %2 {
      %cst_16 = arith.constant 0.000000e+00 : f32
      %45 = vector.broadcast %cst_16 : f32 to vector<8x128xf32>
      %c0_17 = arith.constant 0 : index
      %c0_18 = arith.constant 0 : index
      %46 = vector.load %arg7[%c0_17, %c0_18] : memref<8x128xf32, #tpu.memory_space<vmem>>, vector<8x128xf32>
      tpu.vector_store %arg7[%c0_17, %c0_18], %45 {strides = array<i32>} : memref<8x128xf32, #tpu.memory_space<vmem>>, vector<8x128xf32>,
    } else {
    }
    %c0 = arith.constant 0 : index
    %3 = memref.load %arg6[%c0] : memref<2xf32, #tpu.memory_space<smem>>
    %c1 = arith.constant 1 : index
    %4 = memref.load %arg6[%c1] : memref<2xf32, #tpu.memory_space<smem>>
    %c0_1 = arith.constant 0 : index
    %c0_2 = arith.constant 0 : index
    %5 = vector.load %arg2[%c0_1, %c0_2] : memref<8x1xf32, #tpu.memory_space<vmem>>, vector<8x1xf32>
    %c0_3 = arith.constant 0 : index
    %c0_4 = arith.constant 0 : index
    %6 = vector.load %arg7[%c0_3, %c0_4] : memref<8x128xf32, #tpu.memory_space<vmem>>, vector<8x128xf32>
    %c0_5 = arith.constant 0 : index
    %c0_6 = arith.constant 0 : index
    %7 = vector.load %arg5[%c0_5, %c0_6] : memref<8x256xf32, #tpu.memory_space<vmem>>, vector<8x128xf32>
    %cst = arith.constant -1.000000e+00 : f32
    %cst_7 = arith.constant 1.000000e+00 : f32
    %8 = vector.broadcast %cst : f32 to vector<8x128xf32>
    %9 = arith.maximumf %8, %7 : vector<8x128xf32>
    %10 = vector.broadcast %cst_7 : f32 to vector<8x128xf32>
    %11 = arith.minimumf %10, %9 : vector<8x128xf32>
    %12 = vector.broadcast %5 : vector<8x1xf32> to vector<8x128xf32>
    %13 = arith.cmpf ogt, %11, %12 : vector<8x128xf32>
    %14 = vector.broadcast %3 : f32 to vector<8x128xf32>
    %15 = arith.addf %14, %11 : vector<8x128xf32>
    %16 = arith.mulf %11, %15 : vector<8x128xf32>
    %17 = arith.select %13, %16, %11 : vector<8x128xi1>, vector<8x128xf32>
    %cst_8 = arith.constant 6.400000e+01 : f32
    %18 = vector.broadcast %cst_8 : f32 to vector<8x128xf32>
    %19 = arith.mulf %17, %18 : vector<8x128xf32>
    %20 = vector.broadcast %4 : f32 to vector<8x128xf32>
    %21 = arith.subf %19, %20 : vector<8x128xf32>
    %22 = math.exp %21 : vector<8x128xf32>
    %23 = arith.addf %6, %22 : vector<8x128xf32>
    %c0_9 = arith.constant 0 : index
    %c128 = arith.constant 128 : index
    %24 = vector.load %arg5[%c0_9, %c128] : memref<8x256xf32, #tpu.memory_space<vmem>>, vector<8x128xf32>
    %cst_10 = arith.constant -1.000000e+00 : f32
    %cst_11 = arith.constant 1.000000e+00 : f32
    %25 = vector.broadcast %cst_10 : f32 to vector<8x128xf32>
    %26 = arith.maximumf %25, %24 : vector<8x128xf32>
    %27 = vector.broadcast %cst_11 : f32 to vector<8x128xf32>
    %28 = arith.minimumf %27, %26 : vector<8x128xf32>
    %29 = vector.broadcast %5 : vector<8x1xf32> to vector<8x128xf32>
    %30 = arith.cmpf ogt, %28, %29 : vector<8x128xf32>
    %31 = vector.broadcast %3 : f32 to vector<8x128xf32>
    %32 = arith.addf %31, %28 : vector<8x128xf32>
    %33 = arith.mulf %28, %32 : vector<8x128xf32>
    %34 = arith.select %30, %33, %28 : vector<8x128xi1>, vector<8x128xf32>
    %cst_12 = arith.constant 6.400000e+01 : f32
    %35 = vector.broadcast %cst_12 : f32 to vector<8x128xf32>
    %36 = arith.mulf %34, %35 : vector<8x128xf32>
    %37 = vector.broadcast %4 : f32 to vector<8x128xf32>
    %38 = arith.subf %36, %37 : vector<8x128xf32>
    %39 = math.exp %38 : vector<8x128xf32>
    %40 = arith.addf %23, %39 : vector<8x128xf32>
    %c0_13 = arith.constant 0 : index
    %c0_14 = arith.constant 0 : index
    %41 = vector.load %arg7[%c0_13, %c0_14] : memref<8x128xf32, #tpu.memory_space<vmem>>, vector<8x128xf32>
    tpu.vector_store %arg7[%c0_13, %c0_14], %40 {strides = array<i32>} : memref<8x128xf32, #tpu.memory_space<vmem>>, vector<8x128xf32>,
    %c3_i32 = arith.constant 3 : i32
    %42 = arith.cmpi eq, %arg1, %c3_i32 : i32
    %43 = arith.extui %42 : i1 to i32
    %c0_i32_15 = arith.constant 0 : i32
    %44 = arith.cmpi ne, %43, %c0_i32_15 : i32
    scf.if %44 {
      %cst_16 = arith.constant dense<0.000000e+00> : vector<8xf32>
      %45 = vector.multi_reduction <add>, %40, %cst_16 [1] : vector<8x128xf32> to vector<8xf32>
      %46 = vector.shape_cast %45 : vector<8xf32> to vector<8x1xf32>
      %c0_17 = arith.constant 0 : index
      %c0_18 = arith.constant 0 : index
      %47 = vector.load %arg3[%c0_17, %c0_18] : memref<8x1xf32, #tpu.memory_space<vmem>>, vector<8x1xf32>
      %c0_19 = arith.constant 0 : index
      %c0_20 = arith.constant 0 : index
      %48 = vector.load %arg4[%c0_19, %c0_20] : memref<8x1xf32, #tpu.memory_space<vmem>>, vector<8x1xf32>
      %49 = vector.broadcast %4 : f32 to vector<8x1xf32>
      %50 = arith.subf %47, %49 : vector<8x1xf32>
      %51 = math.exp %50 : vector<8x1xf32>
      %52 = vector.broadcast %4 : f32 to vector<8x1xf32>
      %53 = arith.subf %48, %52 : vector<8x1xf32>
      %54 = math.exp %53 : vector<8x1xf32>
      %55 = arith.subf %51, %54 : vector<8x1xf32>
      %56 = arith.addf %46, %55 : vector<8x1xf32>
      %57 = math.log %56 : vector<8x1xf32>
      %58 = vector.broadcast %4 : f32 to vector<8x1xf32>
      %59 = arith.addf %58, %57 : vector<8x1xf32>
      %60 = arith.subf %59, %47 : vector<8x1xf32>
      %61 = vector.shape_cast %60 : vector<8x1xf32> to vector<8x1xf32>
      %62 = vector.broadcast %61 : vector<8x1xf32> to vector<8x128xf32>
      %c0_21 = arith.constant 0 : index
      %c0_22 = arith.constant 0 : index
      %63 = vector.load %arg7[%c0_21, %c0_22] : memref<8x128xf32, #tpu.memory_space<vmem>>, vector<8x128xf32>
      tpu.vector_store %arg7[%c0_21, %c0_22], %62 {strides = array<i32>} : memref<8x128xf32, #tpu.memory_space<vmem>>, vector<8x128xf32>,
    } else {
    }
    return
  }
  func.func @transform_0(%arg0: i32, %arg1: i32) -> (i32, i32) {
    %c0_i32 = arith.constant 0 : i32
    %c0_i32_0 = arith.constant 0 : i32
    return %arg0, %c0_i32 : i32, i32
  }
  func.func @transform_1(%arg0: i32, %arg1: i32) -> (i32, i32) {
    %c0_i32 = arith.constant 0 : i32
    %c0_i32_0 = arith.constant 0 : i32
    return %arg0, %c0_i32 : i32, i32
  }
  func.func @transform_2(%arg0: i32, %arg1: i32) -> (i32, i32) {
    %c0_i32 = arith.constant 0 : i32
    %c0_i32_0 = arith.constant 0 : i32
    return %arg0, %c0_i32 : i32, i32
  }
  func.func @transform_3(%arg0: i32, %arg1: i32) -> (i32, i32) {
    %c0_i32 = arith.constant 0 : i32
    return %arg0, %arg1 : i32, i32
  }
  func.func @transform_4(%arg0: i32, %arg1: i32) -> i32 {
    %c0_i32 = arith.constant 0 : i32
    %c0_i32_0 = arith.constant 0 : i32
    return %c0_i32 : i32
  }
  func.func @transform_5(%arg0: i32, %arg1: i32) -> (i32, i32) {
    %c0_i32 = arith.constant 0 : i32
    %c0_i32_0 = arith.constant 0 : i32
    return %arg0, %c0_i32 : i32, i32
  }
}

</mosaic_0001>

<bundles_post_ra>
// kernel: tpu_custom_call.1
= control target key start
LH: loop header
LB: loop body
LE: loop exit
PB: predicated region body
PF: predicated region fallthrough
CT: control target
= control target key end

     0   :  { %s1136_s0 = inlined_call_operand.vmem [shape: f32[16,1], index: 0, kind: input, shape index: {}]   ;;  %s1137_s1 = inlined_call_operand.vmem [shape: f32[16,1], index: 1, kind: input, shape index: {}]   ;;  %s1138_s2 = inlined_call_operand.vmem [shape: f32[16,1], index: 2, kind: input, shape index: {}]   ;;  %s1139_s3 = inlined_call_operand.hbm [shape: f32[16,1024], index: 3, kind: input, shape index: {}]   ;;  %s1140_s4 = inlined_call_operand.vmem [shape: f32[2], index: 4, kind: input, shape index: {}]   ;;  %s1141_s5 = inlined_call_operand.hbm [shape: f32[16,128], index: 5, kind: output, shape index: {}]  }
   0x1   :  { %1150 = sst [smem:[#allocation16_spill]] %s1137_s1 }
   0x2   :  { %1151 = sst [smem:[#allocation17_spill]] %s1138_s2 }
   0x3   :  { %1152 = sst [smem:[#allocation18_spill]] %s1140_s4 }
   0x4   :  { %1153 = sst [smem:[#allocation19_spill]] %s1141_s5 }
   0x5   :  { %10 = vsyncpa [#allocation3], 0 }
   0x6   :  { %12 = vsyncpa [#allocation3 + $0x1], 0 }
   0x7   :  { %13 = vsyncpa [#allocation5], 0 }
   0x8   :  { %14 = vsyncpa [#allocation4], 0 }
   0x9   :  { %16 = vsyncpa [#allocation4 + $0x1], 0  ;;  %s894_s18 = smov 0   ;;  %s896_s19 = smov 0  }
   0xa   :  { %s898_s20 = smov 0   ;;  %s900_s21 = smov 0  }
   0xb   :  { %s902_s22 = smov 0   ;;  %s904_s23 = smov 0  }
   0xc   :  { %s906_s24 = smov 0   ;;  %s908_s25 = smov 0  }
   0xd   :  { %s910_s26 = smov 0   ;;  %s912_s27 = smov 0  }
   0xe   :  { %s914_s28 = smov 0  }
   0xf LB: > { %1154 = sst [smem:[#allocation11_spill]] %s816_s18  ;;  %s536_s29 = sadd.s32 4294967295, %s856_s28   ;;  %s856_s28 = sphi %s914_s28, %s22_s28   ;;  %s852_s27 = sphi %s912_s27, %s1193_s27   ;;  %s848_s26 = sphi %s910_s26, %s1192_s26   ;;  %s844_s25 = sphi %s908_s25, %s1191_s25   ;;  %s840_s24 = sphi %s906_s24, %s1190_s24   ;;  %s836_s23 = sphi %s904_s23, %s1189_s23   ;;  %s832_s22 = sphi %s902_s22, %s1188_s22   ;;  %s828_s21 = sphi %s900_s21, %s1187_s21   ;;  %s824_s20 = sphi %s898_s20, %s1186_s20   ;;  %s820_s19 = sphi %s896_s19, %s1185_s19   ;;  %s816_s18 = sphi %s894_s18, %s1184_s18  }
  0x10   : > { %1155 = sst [smem:[#allocation12_spill]] %s840_s24  ;;  %s537_s30 = sadd.s32 4294967294, %s856_s28  }
  0x11   : > { %p134_p0 = scmp.ne.s32.totalorder %s832_s22, %s828_s21  ;;  %p950_p1 = scmp.eq.s32.totalorder %s536_s29, 0 }
  0x12   : > { %p178_p2 = scmp.ne.s32.totalorder %s824_s20, %s820_s19  ;;  %p179_p4 = scmp.eq.s32.totalorder %s536_s29, 7 }
  0x13   : > { %p959_p3 = por %p950_p1, %p134_p0  ;;  %p184_p5 = scmp.ne.s32.totalorder %s820_s19, %s816_s18 }
  0x14   : > { %p185_p6 = scmp.eq.s32.totalorder %s537_s30, 7  ;;  %p965_p7 = por %p179_p4, %p178_p2 }
  0x15   : > { %s1157_s8 = scalar_select %p959_p3, 1, 0 }
  0x16   : > { %s1158_s9 = scalar_select %p965_p7, 1, 0 }
  0x17   : > { %p538_p8 = scmp.ge.s32.totalorder %s856_s28, 1  ;;  %p970_p9 = por %p185_p6, %p184_p5 }
  0x18   : > { %1159 = sst [smem:[#allocation13_spill]] %s1158_s9  ;;  %p192_p10 = scmp.lt.s32.totalorder %s856_s28, 9 }
  0x19   : > { %s1160_s10 = scalar_select %p970_p9, 1, 0 }
  0x1a   : > { %s1162_s4 = sld [smem:[#allocation18_spill]]  ;;  %p978_p11 = pnand %p538_p8, %p192_p10 }
  0x1b   : > { %1161 = sst [smem:[#allocation14_spill]] %s1160_s10  ;;  %s31_s15 = sadd.s32 1, %s848_s26 }
  0x1c   : > { %p569_p12 = pneg %p978_p11 }
  0x1e   : > { %p570_p13 = pnand %p569_p12, %p950_p1 }
  0x20   : > { %s205_s13 = sshll.u32 %s1162_s4, 4  ;;  %p691_p2 = pneg %p570_p13  ;;  %s206_s13 = int_to_ptr.vmem [resolvable:$true] %s205_s13 }
  0x21   : > { %s689_s16 = scalar_lea.vmem %s206_s13, 16  ;;  %p697_p6 = scmp.lt.s32.totalorder %s206_s13, %s206_s13 }
  0x22   : > { %p690_p0 = scmp.ne.s32.totalorder %s206_s13, %s689_s16  ;;  %p698_p9 = scmp.lt.s32.totalorder %s689_s16, %s689_s16 }
  0x24   : > { %p692_p4 = pnand %p691_p2, %p690_p0  ;;  %p699_p7 = por %p698_p9, %p697_p6 }
  0x26   : > { %p693_p5 = pneg %p692_p4 }
  0x28   : > { %p700_p3 = pnand %p699_p7, %p693_p5 }
  0x2a   : > { %703 = shalt.err (!%p700_p3)
}
  0x2b   : > { %s858_s17 = smov [#allocation6]   ;;  %p32_p8 = scmp.ge.s32.totalorder %s31_s15, 4 }
  0x2c   : > { %572 = dma.vmem_to_smem (!%p570_p13), %s206_s13, 16, %s858_s17, [#allocation5]  }
  0x2d   : > { %s34_s21 = sadd.s32 1, %s852_s27  ;;  %s121_s29 = sadd.s32 1, %s836_s23 }
  0x2e   : > { %p128_p10 = scmp.ne.s32.totalorder %s836_s23, %s832_s22  ;;  %s1195_s15 = smov (%p32_p8, %s31_s15), 0 }
  0x2f   : > { %1164 = sst [smem:[#allocation15_spill]] %s1195_s15  ;;  %s1197_s21 = smov (!%p32_p8, %s34_s21), %s852_s27 }
  0x30   : > { %s117_s30 = ssub.s32 %s848_s26, %s1195_s15  ;;  %p129_p3 = scmp.eq.s32.totalorder %s856_s28, 0 }
  0x31   : > { %p36_p7 = scmp.ge.s32.totalorder %s1197_s21, 2  ;;  %p582_p9 = scmp.lt.s32.totalorder %s856_s28, 8 }
  0x32   : > { %p998_p12 = por %p129_p3, %p128_p10  ;;  %s237_s12 = sand.u32 1, %s836_s23  }
  0x33   : > { %s1199_s21 = smov (%p36_p7, %s1197_s21), 0  ;;  %s541_s13 = sshll.u32 %s237_s12, 4 }
  0x34   : > { %s116_s16 = ssub.s32 %s852_s27, %s1199_s21  ;;  %s542_s7 = sshll.u32 %s848_s26, 1 }
  0x35   : > { %s118_s17 = sor.u32 %s117_s30, %s116_s16  ;;  %p166_p13 = scmp.eq.s32.totalorder %s116_s16, 0 }
  0x36   : > { %p119_p0 = scmp.eq.s32.totalorder %s118_s17, 0  ;;  %s1166_s4 = sadd.s32 1, %s824_s20 }
  0x37   : > { %s1011_s15 = scalar_select %p166_p13, %s824_s20, %s1166_s4  }
  0x38   : > { %s1014_s10 = scalar_select %p119_p0, %s836_s23, %s121_s29  }
  0x39   : > { %s543_s18 = sshll.u32 %s852_s27, 3  ;;  %s241_s5 = scalar_lea.vmem [#allocation2], %s541_s13 }
  0x3a   : > { %s251_s9 = sshll.u32 %s241_s5, 4  ;;  %s247_s24 = sadd.s32 %s543_s18, %s542_s7  ;;  %s252_s9 = int_to_ptr.vmem [resolvable:$true] %s251_s9 }
  0x3b   : > { %s544_s2 = sshll.u32 %s247_s24, 7  ;;  %p1021_p2 = pnand %p582_p9, %p998_p12 }
  0x3c   : > { %s249_s4 = scalar_lea.hbm %s1139_s3, %s544_s2  ;;  %s238_s17 = scalar_lea.sflag [#allocation3], %s237_s12 }
  0x3d   : > { %p706_p4 = pneg %p1021_p2  ;;  %s717_s29 = scalar_lea.vmem %s252_s9, 256 }
  0x3e   : > { %p718_p5 = scmp.ne.s32.totalorder %s252_s9, %s717_s29  ;;  %s859_s5 = smov [#allocation2]  }
  0x3f   : > { %s722_s18 = sshll.u32 %s859_s5, 4  ;;  %s723_s18 = int_to_ptr.vmem [resolvable:$false] %s722_s18 }
  0x40   : > { %p720_p6 = pnand %p718_p5, %p706_p4  ;;  %s724_s24 = scalar_lea.vmem %s723_s18, 512 }
  0x41   : > { %p725_p10 = scmp.lt.s32.totalorder %s252_s9, %s723_s18  ;;  %p726_p3 = scmp.lt.s32.totalorder %s724_s24, %s717_s29 }
  0x42   : > { %p721_p8 = pneg %p720_p6 }
  0x43   : > { %p727_p7 = por %p726_p3, %p725_p10 }
  0x45   : > { %p728_p9 = pnand %p727_p7, %p721_p8 }
  0x47   : > { %731 = shalt.err (!%p728_p9)
}
  0x48   : > { %576 = dma.hbm_to_vmem [thread:$0]  (!%p1021_p2), %s249_s4, 256, %s252_s9, %s238_s17  }
  0x49   : > { %260 = sbr.rel (%p978_p11) target bundleno = 566 (0x236), region = 40  ;;  %s262_s2 = sand.u32 (!%p978_p11), 1, %s832_s22  }
  0x4a   : > { %s546_s7 = sshll.u32 (!%p978_p11), %s262_s2, 4  ;;  %s263_s11 = scalar_lea.sflag (!%p978_p11), [#allocation3], %s262_s2 }
  0x4b   : > { %s266_s12 = scalar_lea.vmem (!%p978_p11), [#allocation2], %s546_s7  ;;  %p1168_p12 = scmp.ne.s32.totalorder (!%p978_p11), %s1157_s8, 0 }
  0x4e   : > { %803 = dma.done.wait (%p1168_p12), %s263_s11, 256  }
  0x4f   : > { %805 = vsyncadd (%p1168_p12), %s263_s11, 4294967040 }
  0x50   : > { %807 = dma.done.wait (%p950_p1), [#allocation5], 16  }
  0x51   : > { %809 = vsyncadd (%p950_p1), [#allocation5], 4294967280 }
  0x52   : > { %275 = sfence }
  0x53   : > { %s307_s1 = sand.u32 1, %s820_s19   ;;  %p310_p11 = scmp.lt.s32.totalorder %s844_s25, 1 }
  0x54   : > { %s548_s9 = sshll.u32 %s307_s1, 3  ;;  %s1169_s17 = sld [smem:[#allocation16_spill]] }
  0x55   : > { %s311_s14 = scalar_select %p310_p11, %s844_s25, 1 }
  0x56   : > { %s1170_s24 = sld [smem:[#allocation17_spill]]  ;;  %s1062_s7 = scalar_lea.vmem [#allocation7], %s548_s9 }
  0x57   : > { %s1048_s13 = sshll.u32 %s311_s14, 3  ;;  %s1171_s11 = sld [smem:[#allocation12_spill]] }
  0x58   : > { %s313_s6 = scalar_lea.vmem %s1136_s0, %s1048_s13 }
  0x5a   : > { %s317_s29 = scalar_lea.vmem %s1169_s17, %s1048_s13 }
  0x5c   : > { %s321_s2 = scalar_lea.vmem %s1170_s24, %s1048_s13 }
  0x5d   : > { %p552_p1 = scmp.ne.s32.totalorder %s1171_s11, 0 }
  0x5f   : > { %326 = sbr.rel (%p552_p1) target bundleno = 102 (0x66), region = 52 }
  0x64   : > { %v860_v0 = vmov 0.0  }
  0x65   : > { %327 = vst [vmem:[%s1062_s7] sm:$0xff] %v860_v0 }
  0x66 PF: > { %v330_v1 = vld [vmem:[%s313_s6] sm:$0xff]  ;;  %v861_v2 = vmov 0   ;;  %s328_s14 = sld [smem:[#allocation6]]  ;;  %v351_v4 = vld [vmem:[%s266_s12 + $0x8] sm:$0xff] }
  0x67   : > { %677 = vset.pattern.permute.xlu0 %v861_v2  ;;  %v332_v3 = vld [vmem:[%s266_s12] sm:$0xff]  ;;  %v555_v6 = vclamps-f32 %v351_v4, 1.0  ;;  %s553_s8 = sld [smem:[#allocation6 + $0x1]] }
  0x68   : > { %337 = vperm.xlu0 %677, %v330_v1   ;;  %v554_v5 = vclamps-f32 %v332_v3, 1.0  ;;  %s1172_s12 = sld [smem:[#allocation12_spill]] }
  0x6c   : > { %v341_v7 = vstv %s328_s14  ;;  %v331_v22 = vld [vmem:[%s1062_s7] sm:$0xff] }
  0x6d   : > { %v342_v8 = vadd.f32 %v554_v5, %v341_v7  ;;  %v355_v9 = vadd.f32 %v555_v6, %v341_v7  ;;  %v346_v14 = vstv %s553_s8 }
  0x6e   : > { %p556_p13 = scmp.ne.s32.totalorder %s1172_s12, 3 }
  0x6f   : > { %v343_v10 = vmul.f32 %v554_v5, %v342_v8  ;;  %v356_v11 = vmul.f32 %v555_v6, %v355_v9 }
  0xe3   : > { %v338_v12 = vpop.permute.xlu0 %337 }
  0xe4   : > { %vm340_vm0 = vcmp.gt.f32.partialorder %v554_v5, %v338_v12  ;;  %vm354_vm1 = vcmp.gt.f32.partialorder %v555_v6, %v338_v12 }
  0xe5   : > { %v344_v13 = vsel %vm340_vm0, %v343_v10, %v554_v5  ;;  %v357_v15 = vsel %vm354_vm1, %v356_v11, %v555_v6 }
  0xe6   : > { %v345_v16 = vmul.f32 64.0, %v344_v13  ;;  %v358_v17 = vmul.f32 64.0, %v357_v15 }
  0xe8   : > { %v347_v18 = vsub.f32 %v345_v16, %v346_v14  ;;  %v359_v19 = vsub.f32 %v358_v17, %v346_v14 }
  0xea   : > { %v348_v20 = vmul.f32 1.442695, %v347_v18  ;;  %v360_v21 = vmul.f32 1.442695, %v359_v19 }
  0xec   : > { %678 = vpow2.f32 %v348_v20 }
  0xed   : > { %680 = vpow2.f32 %v360_v21 }
  0xf9   : > { %v679_v23 = vpop.eup %678 }
  0xfa   : > { %v350_v24 = vadd.f32 %v679_v23, %v331_v22  ;;  %v681_v25 = vpop.eup %680  ;;  %367 = sbr.rel (%p556_p13) target bundleno = 540 (0x21c), region = 56 }
  0xfc   : > { %v362_v26 = vadd.f32 %v681_v25, %v350_v24 }
  0xfe   : > { %363 = vst [vmem:[%s1062_s7] sm:$0xff] %v362_v26 }
  0xff   : > { %368 = vadd.xlane.f32.xlu0 %v362_v26  ;;  %v862_v27 = vmov 0   ;;  %v370_v28 = vld [vmem:[%s317_s29] sm:$0xff] }
 0x100   : > { %682 = vset.pattern.permute.xlu0 %v862_v27  ;;  %v371_v29 = vld [vmem:[%s321_s2] sm:$0xff]  ;;  %v372_v30 = vsub.f32 %v370_v28, %v346_v14 }
 0x101   : > { %v375_v31 = vsub.f32 %v371_v29, %v346_v14 }
 0x102   : > { %v373_v32 = vmul.f32 1.442695, %v372_v30 }
 0x103   : > { %v376_v33 = vmul.f32 1.442695, %v375_v31 }
 0x104   : > { %683 = vpow2.f32 %v373_v32 }
 0x105   : > { %685 = vpow2.f32 %v376_v33 }
 0x111   : > { %v684_v34 = vpop.eup %683 }
 0x112   : > { %v686_v35 = vpop.eup %685 }
 0x113   : > { %v378_v36 = vsub.f32 %v684_v34, %v686_v35 }
 0x188   : > { %v369_v37 = vpop.xlane.xlu0 %368 }
 0x189   : > { %v379_v38 = vadd.f32 %v378_v36, %v369_v37 }
 0x18b   : > { %687 = vlog2.f32 %v379_v38 }
 0x198   : > { %v688_v39 = vpop.eup %687 }
 0x199   : > { %v381_v40 = vmul.f32 0.6931472, %v688_v39 }
 0x19b   : > { %v382_v41 = vadd.f32 %v381_v40, %v346_v14 }
 0x19d   : > { %v383_v42 = vsub.f32 %v382_v41, %v370_v28 }
 0x19f   : > { %386 = vperm.xlu0 %682, %v383_v42  }
 0x21a   : > { %v387_v43 = vpop.permute.xlu0 %386 }
 0x21b   : > { %389 = vst [vmem:[%s1062_s7] sm:$0xff] %v387_v43 }
 0x21c PF: > { %s1175_s13 = sld [smem:[#allocation13_spill]]  ;;  %s558_s29 = sshll.u32 %s844_s25, 7 }
 0x21d   : > { %s1176_s24 = sld [smem:[#allocation19_spill]]  ;;  %s404_s14 = sshll.u32 %s1062_s7, 4  ;;  %s405_s14 = int_to_ptr.vmem [resolvable:$true] %s404_s14 }
 0x21e   : > { %s391_s8 = scalar_lea.sflag [#allocation4], %s307_s1  ;;  %s732_s12 = scalar_lea.vmem %s405_s14, 128 }
 0x21f   : > { %p733_p0 = scmp.ne.s32.totalorder %s405_s14, %s732_s12  ;;  %s863_s9 = smov [#allocation7]  }
 0x220   : > { %s736_s30 = sshll.u32 %s863_s9, 4  ;;  %s737_s30 = int_to_ptr.vmem [resolvable:$false] %s736_s30 }
 0x221   : > { %s738_s6 = scalar_lea.vmem %s737_s30, 256  ;;  %p739_p6 = scmp.lt.s32.totalorder %s405_s14, %s737_s30 }
 0x222   : > { %p1178_p2 = scmp.ne.s32.totalorder %s1175_s13, 0  ;;  %p740_p8 = scmp.lt.s32.totalorder %s738_s6, %s732_s12 }
 0x223   : > { %s1177_s2 = smov %s1176_s24  ;;  %s402_s11 = scalar_lea.hbm %s1176_s24, %s558_s29 }
 0x224   : > { %p734_p4 = pnand %p733_p0, %p1178_p2  ;;  %p741_p10 = por %p740_p8, %p739_p6 }
 0x226   : > { %p735_p5 = pneg %p734_p4 }
 0x228   : > { %p742_p3 = pnand %p741_p10, %p735_p5 }
 0x22a   : > { %745 = shalt.err (!%p742_p3)
}
 0x22b   : > { %s746_s25 = scalar_lea.hbm %s402_s11, 128  ;;  %s750_s16 = scalar_lea.hbm %s1177_s2, 256 }
 0x22c   : > { %p747_p7 = scmp.ne.s32.totalorder %s402_s11, %s746_s25  ;;  %p751_p11 = scmp.lt.s32.totalorder %s402_s11, %s1177_s2 }
 0x22d   : > { %p752_p1 = scmp.lt.s32.totalorder %s750_s16, %s746_s25 }
 0x22e   : > { %p748_p9 = pnand %p747_p7, %p1178_p2 }
 0x22f   : > { %p753_p13 = por %p752_p1, %p751_p11 }
 0x230   : > { %p749_p12 = pneg %p748_p9 }
 0x232   : > { %p754_p0 = pnand %p753_p13, %p749_p12 }
 0x234   : > { %757 = shalt.err (!%p754_p0)
}
 0x235   : > { %567 = dma.vmem_to_hbm [thread:$0]  (%p1178_p2), %s405_s14, 128, %s402_s11, %s391_s8  }
 0x236 PF: > { %s1179_s29 = sld [smem:[#allocation11_spill]]  ;;  %p584_p4 = scmp.ge.s32.totalorder %s856_s28, 2 }
 0x237   : > { %s1180_s5 = sld [smem:[#allocation14_spill]] }
 0x23c   : > { %s416_s18 = sand.u32 1, %s1179_s29  }
 0x23d   : > { %p1181_p5 = scmp.ne.s32.totalorder %s1180_s5, 0  ;;  %s417_s24 = scalar_lea.sflag [#allocation4], %s416_s18 }
 0x23f   : > { %p578_p6 = pnand %p584_p4, %p1181_p5 }
 0x241   : > { %p579_p8 = pneg %p578_p6 }
 0x243   : > { %811 = dma.done.wait (%p579_p8), %s417_s24, 128  }
 0x244   : > { %813 = vsyncadd (%p579_p8), %s417_s24, 4294967168  ;;  %s22_s28 = sadd.s32 1, %s856_s28   ;;  %s1182_s13 = sld [smem:[#allocation15_spill]] }
 0x245   : > { %p19_p10 = scmp.ge.s32.totalorder %s22_s28, 10   ;;  %s1183_s11 = smov %s1199_s21 }
 0x246   : > { %s1184_s18 = smov %s820_s19  ;;  %s1185_s19 = smov %s824_s20 }
 0x247   : > { %s1186_s20 = smov %s1011_s15  ;;  %s1187_s21 = smov %s832_s22 }
 0x248   : > { %s1188_s22 = smov %s836_s23  ;;  %s1189_s23 = smov %s1014_s10 }
 0x249   : > { %s1190_s24 = smov %s848_s26  ;;  %s1191_s25 = smov %s852_s27 }
 0x24a   : > { %s1192_s26 = smov %s1182_s13  ;;  %s1193_s27 = smov %s1183_s11 }
 0x24b   :  { %21 = sbr.rel (!%p19_p10) target bundleno = 15 (0xf), region = 107 }
 0x250   :  { %422 = vsyncpa [#allocation3], 1 }
 0x251   :  { %424 = vsyncpa [#allocation3 + $0x1], 1 }
 0x252   :  { %425 = vsyncpa [#allocation4], 1 }
 0x253   :  { %427 = vsyncpa [#allocation4 + $0x1], 1 }
 0x254   :  { %428 = vsyncpa [#allocation5], 1 }
 0x255   :  { %430 = vsyncpa [#allocation5 + $0x1], 1 }

</bundles_post_ra>
